<compile_context>
chip_gen: v7x
topology: tpu7x:2x2x1
jax: 0.10.0
libtpu: 0.0.40
codegen_flags: <defaults>
</compile_context>

<pallas_src>
import jax
import jax.numpy as jnp
from jax.experimental import pallas as pl
from jax.experimental.pallas import tpu as pltpu


_LANES = 128
# ~2 MiB per block: large enough to hit the HBM roofline, small enough that
# 2x(in+out) double-buffered blocks (~8 MiB) fit every chip's scoped VMEM.
_TARGET_BLOCK_BYTES = 2 * 1024 * 1024


def _gelu_kernel(x_ref, o_ref):
    # Exact GELU: x * 0.5 * (1 + erf(x / sqrt(2))), computed in f32 on the VPU.
    x = x_ref[...].astype(jnp.float32)
    inv_sqrt2 = 0.7071067811865476
    y = x * 0.5 * (1.0 + jax.lax.erf(x * inv_sqrt2))
    o_ref[...] = y.astype(o_ref.dtype)


def _block_rows(rows: int, itemsize: int) -> int:
    """Rows per block: full slab if it fits, else a ~2 MiB sublane-aligned tile."""
    # Sublane packing: 8 rows/vreg for 32-bit, 16 for 16-bit, 32 for 8-bit.
    sublane = max(8, 32 // max(itemsize, 1))
    max_rows = max(_TARGET_BLOCK_BYTES // (_LANES * itemsize), sublane)
    max_rows = (max_rows // sublane) * sublane
    if rows <= max_rows:
        return rows  # single block == full array dims (always a legal block)
    return max_rows


@jax.jit
def gelu(x: jax.Array) -> jax.Array:
    """Elementwise exact GELU via a Pallas TPU kernel. Works on any shape."""
    orig_shape = x.shape
    orig_dtype = x.dtype
    n = x.size
    if n == 0:
        return x

    itemsize = jnp.dtype(orig_dtype).itemsize

    flat = jnp.ravel(x)
    rem = n % _LANES
    padded = rem != 0
    if padded:
        # Pad only to the next multiple of 128 (<= 127 elements); gelu(0) == 0
        # so the padded tail is benign and sliced off below.
        flat = jnp.concatenate(
            [flat, jnp.zeros((_LANES - rem,), dtype=orig_dtype)], axis=0
        )
    rows = flat.shape[0] // _LANES
    slab = flat.reshape(rows, _LANES)

    block_rows = _block_rows(rows, itemsize)
    grid = (pl.cdiv(rows, block_rows),)  # partial last block is masked by Pallas

    cost = pl.CostEstimate(
        flops=10 * n,
        transcendentals=n,
        bytes_accessed=2 * n * itemsize,
    )

    out = pl.pallas_call(
        _gelu_kernel,
        out_shape=jax.ShapeDtypeStruct((rows, _LANES), orig_dtype),
        grid_spec=pltpu.PrefetchScalarGridSpec(
            num_scalar_prefetch=0,
            grid=grid,
            in_specs=[pl.BlockSpec((block_rows, _LANES), lambda i: (i, 0))],
            out_specs=pl.BlockSpec((block_rows, _LANES), lambda i: (i, 0)),
        ),
        compiler_params=pltpu.CompilerParams(
            dimension_semantics=("parallel",),
        ),
        cost_estimate=cost,
    )(slab)

    if padded:
        return out.reshape(-1)[:n].reshape(orig_shape)
    return out.reshape(orig_shape)


if __name__ == "__main__":
    key = jax.random.PRNGKey(0)

    # Primary test: small NCHW activation map (divisible by 128 -> copy-free path).
    x = jax.random.normal(key, (2, 4, 16, 16), dtype=jnp.float32)
    y = gelu(x)
    jax.block_until_ready(y)
    y_ref = jax.nn.gelu(x, approximate=False)
    assert y.shape == x.shape and y.dtype == x.dtype
    assert jnp.max(jnp.abs(y - y_ref)) < 1e-5

    # Ragged size (not a multiple of 128) -> exercises the small-pad path.
    x2 = jax.random.normal(jax.random.PRNGKey(1), (3, 5, 7, 11), dtype=jnp.float32)
    y2 = gelu(x2)
    jax.block_until_ready(y2)
    assert jnp.max(jnp.abs(y2 - jax.nn.gelu(x2, approximate=False))) < 1e-5

    # Larger size -> multi-block grid with a partial last block.
    x3 = jax.random.normal(jax.random.PRNGKey(2), (1, 1, 2050, 300), dtype=jnp.float32)
    y3 = gelu(x3)
    jax.block_until_ready(y3)
    assert jnp.max(jnp.abs(y3 - jax.nn.gelu(x3, approximate=False))) < 1e-5

    print("KERNEL_OK")
</pallas_src>

<mosaic_0001>
module attributes {stable_mosaic.version = 11 : i64} {
  func.func @_gelu_kernel(%arg0: i32, %arg1: memref<16x128xf32, #tpu.memory_space<vmem>>, %arg2: memref<16x128xf32, #tpu.memory_space<vmem>>) attributes {dimension_semantics = [#tpu.dimension_semantics<parallel>], iteration_bounds = array<i64: 1>, scalar_prefetch = 0 : i64, scratch_operands = 0 : i64, tpu.core_type = #tpu.core_type<tc>, window_params = [{transform_indices = @transform_0, window_bounds = array<i64: 16, 128>}, {transform_indices = @transform_1, window_bounds = array<i64: 16, 128>}]} {
    %c0 = arith.constant 0 : index
    %c0_0 = arith.constant 0 : index
    %0 = vector.load %arg1[%c0, %c0_0] : memref<16x128xf32, #tpu.memory_space<vmem>>, vector<16x128xf32>
    %cst = arith.constant 5.000000e-01 : f32
    %1 = vector.broadcast %cst : f32 to vector<16x128xf32>
    %2 = arith.mulf %0, %1 : vector<16x128xf32>
    %cst_1 = arith.constant 0.707106769 : f32
    %3 = vector.broadcast %cst_1 : f32 to vector<16x128xf32>
    %4 = arith.mulf %0, %3 : vector<16x128xf32>
    %5 = math.erf %4 : vector<16x128xf32>
    %cst_2 = arith.constant 1.000000e+00 : f32
    %6 = vector.broadcast %cst_2 : f32 to vector<16x128xf32>
    %7 = arith.addf %6, %5 : vector<16x128xf32>
    %8 = arith.mulf %2, %7 : vector<16x128xf32>
    %c0_3 = arith.constant 0 : index
    %c0_4 = arith.constant 0 : index
    %9 = vector.load %arg2[%c0_3, %c0_4] : memref<16x128xf32, #tpu.memory_space<vmem>>, vector<16x128xf32>
    tpu.vector_store %arg2[%c0_3, %c0_4], %8 {strides = array<i32>} : memref<16x128xf32, #tpu.memory_space<vmem>>, vector<16x128xf32>,
    return
  }
  func.func @transform_0(%arg0: i32) -> (i32, i32) {
    %c0_i32 = arith.constant 0 : i32
    %c0_i32_0 = arith.constant 0 : i32
    return %arg0, %c0_i32 : i32, i32
  }
  func.func @transform_1(%arg0: i32) -> (i32, i32) {
    %c0_i32 = arith.constant 0 : i32
    %c0_i32_0 = arith.constant 0 : i32
    return %arg0, %c0_i32 : i32, i32
  }
}

</mosaic_0001>

<bundles_post_ra>
// kernel: gelu.1
= control target key start
LH: loop header
LB: loop body
LE: loop exit
PB: predicated region body
PF: predicated region fallthrough
CT: control target
= control target key end

     0   :  { %s52_s0 = inlined_call_operand.vmem [shape: f32[16,128], index: 0, kind: input, shape index: {}]   ;;  %s53_s1 = inlined_call_operand.vmem [shape: f32[16,128], index: 1, kind: output, shape index: {}]  }
   0x1   :  { %v8_v0 = vld [vmem:[%s52_s0] sm:$0xff]  ;;  %v9_v1 = vld [vmem:[%s52_s0 + $0x8] sm:$0xff] }
   0x2   :  { %v12_v2 = vmul.f32 0.70710677, %v8_v0  ;;  %v13_v3 = vmul.f32 0.70710677, %v9_v1  ;;  %v10_v4 = vmul.f32 0.5, %v8_v0  ;;  %v11_v6 = vmul.f32 0.5, %v9_v1 }
   0x4   :  { %26 = verf.f32 %v12_v2 }
   0x5   :  { %28 = verf.f32 %v13_v3 }
   0xe   :  { %v27_v5 = vpop.eup %26 }
   0xf   :  { %v29_v7 = vpop.eup %28  ;;  %v16_v8 = vadd.f32 1.0, %v27_v5 }
  0x10   :  { %v17_v9 = vadd.f32 1.0, %v29_v7 }
  0x11   :  { %v18_v10 = vmul.f32 %v16_v8, %v10_v4 }
  0x12   :  { %v19_v11 = vmul.f32 %v17_v9, %v11_v6 }
  0x13   :  { %20 = vst [vmem:[%s53_s1] sm:$0xff] %v18_v10 }
  0x14   :  { %21 = vst [vmem:[%s53_s1 + $0x8] sm:$0xff] %v19_v11 }

</bundles_post_ra>
